<compile_context>
chip_gen: v5e
topology: v5e:2x2
jax: 0.10.0
libtpu: 0.0.40
codegen_flags: <defaults>
</compile_context>

<pallas_src>
import numpy as np

import jax
import jax.numpy as jnp
from jax.experimental import pallas as pl


# ----------------------------------------------------------------------------
# Wrapper-side operator algebra (NumPy, float64; done ONCE per model, not jitted)
# ----------------------------------------------------------------------------

def _reflect(p, n):
    """Source index in [0, n) for padded index p under reflect pad=1."""
    s = p - 1
    if s < 0:
        s = -s
    if s > n - 1:
        s = 2 * (n - 1) - s
    return s


def _conv_factors(wgt, h_in, w_in):
    """Reflect-pad(1) + Conv2d(k=4, s=2) acting on a (h_in, w_in*Cin) slab.

    Returns L (KH, Ho, h_in), R (KH, w_in*Cin, Wo*Cout), Ho, Wo such that
        conv(x_slab) = sum_kh  L[kh] @ x_slab @ R[kh]      (bias handled separately).
    """
    KH, KW, Cin, Cout = wgt.shape
    Ho = (h_in + 2 - KH) // 2 + 1
    Wo = (w_in + 2 - KW) // 2 + 1

    L = np.zeros((KH, Ho, h_in), np.float64)                  # row gather (+reflect)
    for kh in range(KH):
        for oh in range(Ho):
            L[kh, oh, _reflect(2 * oh + kh, h_in)] = 1.0

    S = np.zeros((KW, w_in, Wo), np.float64)                  # column taps (+reflect)
    for kw in range(KW):
        for ow in range(Wo):
            S[kw, _reflect(2 * ow + kw, w_in), ow] = 1.0

    R = np.einsum("kwo,hkic->hwioc", S, np.asarray(wgt, np.float64))
    R = R.reshape(KH, w_in * Cin, Wo * Cout)
    return L, R, Ho, Wo


def _pool_factors(h_in, w_in, C):
    """AvgPool2d(3, s=2, p=1, count_include_pad=False) as  AH @ X @ AW  on slabs."""
    Ho = (h_in - 1) // 2 + 1
    Wo = (w_in - 1) // 2 + 1
    AH = np.zeros((Ho, h_in), np.float64)
    for oh in range(Ho):
        lo, hi = max(2 * oh - 1, 0), min(2 * oh + 1, h_in - 1)
        AH[oh, lo:hi + 1] = 1.0 / (hi - lo + 1)
    AWc = np.zeros((w_in, Wo), np.float64)
    for ow in range(Wo):
        lo, hi = max(2 * ow - 1, 0), min(2 * ow + 1, w_in - 1)
        AWc[lo:hi + 1, ow] = 1.0 / (hi - lo + 1)
    AW = np.kron(AWc, np.eye(C, dtype=np.float64))            # (w_in*C, Wo*C)
    return AH, AW, Ho, Wo


def _build_plan(params, N, H, W, C, lane_align=128, row_align=8):
    """Pack every constant operator into ONE f32 array + emit a static plan."""
    chunks = []
    cursor = [0]

    def add(arr):
        arr = np.asarray(arr, np.float32)
        off = cursor[0]
        chunks.append((off, arr))
        cursor[0] = off + ((arr.shape[0] + row_align - 1) // row_align) * row_align
        return off

    I_N = np.eye(N, dtype=np.float64)
    AH_tot = np.eye(H, dtype=np.float64)             # accumulated pool (rows)
    AW_tot = np.eye(W * C, dtype=np.float64)         # accumulated pool (cols)
    curH, curW = H, W
    n_scales = len(params)

    plan, out_layout = [], []
    col = 0
    for s, layers in enumerate(params):
        convs = []
        h_, w_ = curH, curW
        first = True
        for (wgt, bias) in layers[:-1]:
            wgt = np.asarray(wgt, np.float64)
            bias = np.asarray(bias, np.float64)
            KH, cout = wgt.shape[0], wgt.shape[3]
            L, R, ho, wo = _conv_factors(wgt, h_, w_)
            if first:
                # Fuse the accumulated inter-scale AvgPool into this conv so the
                # kernel always reads the original (un-pooled) input slab.
                L = np.einsum("koh,hH->koH", L, AH_tot)      # (KH, ho, H)
                R = np.einsum("cC,kCo->kco", AW_tot, R)      # (KH, W*C, wo*cout)
                first = False
            wc = wo * cout
            Lb = [np.kron(I_N, L[k]) for k in range(KH)]     # batch fold (block-diag)
            l_offs = [add(Lk) for Lk in Lb]
            Rcat = np.concatenate([R[k] for k in range(KH)], axis=1)
            convs.append(dict(
                KH=KH, wc=wc,
                Mo=int(Lb[0].shape[0]), Min=int(Lb[0].shape[1]),
                Kin=int(Rcat.shape[0]),
                l_offs=l_offs, r_off=add(Rcat),
                b_off=add(np.tile(bias, wo).reshape(1, wc))))
            h_, w_ = ho, wo

        # Final nn.Conv2d(cin, 1, 1) as a block-diagonal right matmul (fused epilogue).
        wgt, bias = layers[-1]
        wgt = np.asarray(wgt, np.float64)
        bias = np.asarray(bias, np.float64)
        cin, cout = wgt.shape[2], wgt.shape[3]
        P = np.kron(np.eye(w_, dtype=np.float64), wgt.reshape(cin, cout))
        plan.append(dict(
            convs=convs,
            proj=dict(rows=int(P.shape[0]), wc=w_ * cout,
                      p_off=add(P),
                      b_off=add(np.tile(bias, w_).reshape(1, w_ * cout)))))
        out_layout.append(dict(rows=N * h_, col=col, H=h_, W=w_, C=cout))
        col += w_ * cout

        if s < n_scales - 1:                                  # compose next pool
            AH, AW, curH, curW = _pool_factors(curH, curW, C)
            AH_tot = AH @ AH_tot
            AW_tot = AW_tot @ AW

    lanes = max(a.shape[1] for _, a in chunks)
    lanes = ((lanes + lane_align - 1) // lane_align) * lane_align
    rows = ((cursor[0] + row_align - 1) // row_align) * row_align
    consts = np.zeros((max(rows, row_align), lanes), np.float32)
    for off, a in chunks:
        consts[off:off + a.shape[0], :a.shape[1]] = a

    out_rows = ((max(o["rows"] for o in out_layout) + row_align - 1)
                // row_align) * row_align
    out_lanes = ((col + lane_align - 1) // lane_align) * lane_align
    return consts, plan, out_layout, out_rows, out_lanes


# ----------------------------------------------------------------------------
# The single fused Pallas kernel (whole multi-scale net, one invocation, no grid)
# ----------------------------------------------------------------------------

def _make_kernel(plan, out_layout, out_rows, out_lanes):
    def kernel(x_ref, c_ref, o_ref):
        x = x_ref[...]                               # (N*H, W*C) folded activation slab

        def conv_block(h, cv):
            # 1 wide right matmul (h @ Rcat) + KH small row-gather matmuls
            # + bias + LeakyReLU(0.2).
            r0, kin, wc, kh_n = cv["r_off"], cv["Kin"], cv["wc"], cv["KH"]
            t = jnp.dot(h, c_ref[r0:r0 + kin, 0:kh_n * wc],
                        preferred_element_type=jnp.float32)
            acc = c_ref[cv["b_off"]:cv["b_off"] + 1, 0:wc]     # bias row, broadcasts
            # TODO(synk): on v7x accumulate the kh partials in-place in the MXU result
            # buffer (MRB) via a scratch accumulator instead of a value chain.
            for k in range(kh_n):
                lo = cv["l_offs"][k]
                lk = c_ref[lo:lo + cv["Mo"], 0:cv["Min"]]
                acc = acc + jnp.dot(lk, t[:, k * wc:(k + 1) * wc],
                                    preferred_element_type=jnp.float32)
            return jnp.where(acc >= 0.0, acc, 0.2 * acc)

        # Single merged output slab (one output stream); zero-init then slice-write.
        o_ref[...] = jnp.zeros((out_rows, out_lanes), jnp.float32)
        for s, sc in enumerate(plan):
            h = x
            for cv in sc["convs"]:
                h = conv_block(h, cv)
            pj = sc["proj"]
            y = jnp.dot(h, c_ref[pj["p_off"]:pj["p_off"] + pj["rows"], 0:pj["wc"]],
                        preferred_element_type=jnp.float32)
            y = y + c_ref[pj["b_off"]:pj["b_off"] + 1, 0:pj["wc"]]
            ol = out_layout[s]
            o_ref[0:ol["rows"], ol["col"]:ol["col"] + pj["wc"]] = y

    return kernel


def make_ms_discriminator(params, input_shape):
    """Build a jitted forward for fixed parameters / input shape.

    params: per-scale list of [(w, b), ..., (w_1x1, b)] with conv weights in
            (KH, KW, Cin, Cout) layout.  Input and outputs are NCHW.
    """
    N, C, H, W = input_shape
    consts_np, plan, out_layout, out_rows, out_lanes = _build_plan(params, N, H, W, C)
    consts = jnp.asarray(consts_np)
    kernel = _make_kernel(plan, out_layout, out_rows, out_lanes)

    # ONE pallas_call, no grid: both conv stacks, the fused pooling and the 1x1
    # heads run in a single kernel invocation; the input slab, the packed operators
    # (< 600 KB) and every intermediate activation stay resident in VMEM.
    call = pl.pallas_call(
        kernel,
        out_shape=jax.ShapeDtypeStruct((out_rows, out_lanes), jnp.float32),
    )

    @jax.jit
    def forward(x_nchw):
        x = jnp.transpose(x_nchw.astype(jnp.float32), (0, 2, 3, 1))
        x = x.reshape(N * H, W * C)                  # lane-dense, batch-folded slab
        packed = call(x, consts)
        outs = []
        for ol in out_layout:
            y = packed[:ol["rows"], ol["col"]:ol["col"] + ol["W"] * ol["C"]]
            outs.append(y.reshape(N, ol["H"], ol["W"], ol["C"]).transpose(0, 3, 1, 2))
        return outs

    return forward


# ----------------------------------------------------------------------------
# Parameters + float64 NumPy reference (mirrors the PyTorch module exactly)
# ----------------------------------------------------------------------------

def init_params(key, *, input_dim, dim, n_layer, n_scales):
    """Deterministic synthetic parameters; conv weights stored as (KH, KW, Cin, Cout)."""
    params = []
    for _ in range(n_scales):
        layers = []
        cin, d = input_dim, dim
        key, kw_, kb_ = jax.random.split(key, 3)
        layers.append((jax.random.normal(kw_, (4, 4, cin, d)) * 0.05,
                       jax.random.normal(kb_, (d,)) * 0.05))
        cin = d
        for _ in range(n_layer - 1):
            key, kw_, kb_ = jax.random.split(key, 3)
            layers.append((jax.random.normal(kw_, (4, 4, cin, 2 * cin)) * 0.05,
                           jax.random.normal(kb_, (2 * cin,)) * 0.05))
            cin = 2 * cin
        key, kw_, kb_ = jax.random.split(key, 3)
        layers.append((jax.random.normal(kw_, (1, 1, cin, 1)) * 0.05,
                       jax.random.normal(kb_, (1,)) * 0.05))
        params.append(layers)
    return params


def _ref_forward_np(x_nchw, params):
    """float64 NumPy reference of MSDiscriminator.forward (NCHW)."""
    x = np.asarray(x_nchw, np.float64)

    def conv_block(x, w, b):
        w = np.asarray(w, np.float64)
        b = np.asarray(b, np.float64)
        xp = np.pad(x, ((0, 0), (0, 0), (1, 1), (1, 1)), mode="reflect")
        KH, KW, _, Cout = w.shape
        n, _, Hp, Wp = xp.shape
        Ho, Wo = (Hp - KH) // 2 + 1, (Wp - KW) // 2 + 1
        y = np.zeros((n, Cout, Ho, Wo), np.float64)
        for kh in range(KH):
            for kw in range(KW):
                patch = xp[:, :, kh:kh + 2 * Ho:2, kw:kw + 2 * Wo:2]
                y += np.einsum("nchw,cd->ndhw", patch, w[kh, kw])
        y += b.reshape(1, -1, 1, 1)
        return np.where(y >= 0, y, 0.2 * y)

    def avgpool(x):
        n, c, H, W = x.shape
        Ho, Wo = (H - 1) // 2 + 1, (W - 1) // 2 + 1
        xp = np.pad(x, ((0, 0), (0, 0), (1, 1), (1, 1)))
        s = np.zeros((n, c, Ho, Wo), np.float64)
        for kh in range(3):
            for kw in range(3):
                s += xp[:, :, kh:kh + 2 * Ho:2, kw:kw + 2 * Wo:2]
        ih, iw = np.arange(Ho), np.arange(Wo)
        rows = np.minimum(2 * ih + 1, H - 1) - np.maximum(2 * ih - 1, 0) + 1
        cols = np.minimum(2 * iw + 1, W - 1) - np.maximum(2 * iw - 1, 0) + 1
        return s / (rows[:, None] * cols[None, :]).astype(np.float64)[None, None]

    outs = []
    h_in = x
    for s, layers in enumerate(params):
        h = h_in
        for (w, b) in layers[:-1]:
            h = conv_block(h, w, b)
        w1 = np.asarray(layers[-1][0], np.float64)
        b1 = np.asarray(layers[-1][1], np.float64)
        o = np.einsum("nchw,cd->ndhw", h, w1[0, 0]) + b1.reshape(1, -1, 1, 1)
        outs.append(o)
        if s < len(params) - 1:
            h_in = avgpool(h_in)
    return outs


if __name__ == "__main__":
    key = jax.random.PRNGKey(0)
    kx, kp = jax.random.split(key)

    # Small shapes consistent with the module: batch=2, channels=4, spatial=16.
    x = jax.random.normal(kx, (2, 4, 16, 16), jnp.float32)
    params = init_params(kp, input_dim=4, dim=8, n_layer=2, n_scales=2)

    fwd = make_ms_discriminator(params, x.shape)
    outs = jax.block_until_ready(fwd(x))

    # Scale 0: 16 -> 8 -> 4, 1x1  => (2, 1, 4, 4)
    # Scale 1 (avgpool 16->8 fused): 8 -> 4 -> 2, 1x1 => (2, 1, 2, 2)
    assert outs[0].shape == (2, 1, 4, 4), outs[0].shape
    assert outs[1].shape == (2, 1, 2, 2), outs[1].shape
    assert all(bool(jnp.isfinite(o).all()) for o in outs)

    # Validate against a float64 NumPy reference of the PyTorch module.
    refs = _ref_forward_np(np.asarray(x), params)
    for o, r in zip(outs, refs):
        np.testing.assert_allclose(np.asarray(o), np.asarray(r, np.float32),
                                   rtol=1e-4, atol=2e-5)

    print("KERNEL_OK")
</pallas_src>

<mosaic_0001>
module attributes {stable_mosaic.version = 11 : i64} {
  func.func @kernel(%arg0: memref<32x64xf32, #tpu.memory_space<vmem>>, %arg1: memref<528x256xf32, #tpu.memory_space<vmem>>, %arg2: memref<8x128xf32, #tpu.memory_space<vmem>>) attributes {dimension_semantics = [], scalar_prefetch = 0 : i64, scratch_operands = 0 : i64, tpu.core_type = #tpu.core_type<tc>} {
    %c0 = arith.constant 0 : index
    %c0_0 = arith.constant 0 : index
    %0 = vector.load %arg0[%c0, %c0_0] : memref<32x64xf32, #tpu.memory_space<vmem>>, vector<32x64xf32>
    %cst = arith.constant 0.000000e+00 : f32
    %1 = vector.broadcast %cst : f32 to vector<8x128xf32>
    %c0_1 = arith.constant 0 : index
    %c0_2 = arith.constant 0 : index
    %2 = vector.load %arg2[%c0_1, %c0_2] : memref<8x128xf32, #tpu.memory_space<vmem>>, vector<8x128xf32>
    tpu.vector_store %arg2[%c0_1, %c0_2], %1 {strides = array<i32>} : memref<8x128xf32, #tpu.memory_space<vmem>>, vector<8x128xf32>,
    %c64 = arith.constant 64 : index
    %c0_3 = arith.constant 0 : index
    %3 = vector.load %arg1[%c64, %c0_3] : memref<528x256xf32, #tpu.memory_space<vmem>>, vector<64x256xf32>
    %cst_4 = arith.constant dense<0.000000e+00> : vector<32x256xf32>
    %4 = tpu.matmul %0, %3, %cst_4 {dimension_numbers = #tpu.dot_dimension_numbers<[1], [0], [0], [1], [0, 0, 1, 1], [], []>} : vector<32x64xf32>, vector<64x256xf32>, vector<32x256xf32> -> vector<32x256xf32>
    %c128 = arith.constant 128 : index
    %c0_5 = arith.constant 0 : index
    %5 = vector.load %arg1[%c128, %c0_5] : memref<528x256xf32, #tpu.memory_space<vmem>>, vector<1x64xf32>
    %c0_6 = arith.constant 0 : index
    %c0_7 = arith.constant 0 : index
    %6 = vector.load %arg1[%c0_6, %c0_7] : memref<528x256xf32, #tpu.memory_space<vmem>>, vector<16x32xf32>
    %7 = vector.extract_strided_slice %4 {offsets = [0, 0], sizes = [32, 64], strides = [1, 1]} : vector<32x256xf32> to vector<32x64xf32>
    %cst_8 = arith.constant dense<0.000000e+00> : vector<16x64xf32>
    %8 = tpu.matmul %6, %7, %cst_8 {dimension_numbers = #tpu.dot_dimension_numbers<[1], [0], [0], [1], [0, 0, 1, 1], [], []>} : vector<16x32xf32>, vector<32x64xf32>, vector<16x64xf32> -> vector<16x64xf32>
    %9 = vector.broadcast %5 : vector<1x64xf32> to vector<16x64xf32>
    %10 = arith.addf %9, %8 : vector<16x64xf32>
    %c16 = arith.constant 16 : index
    %c0_9 = arith.constant 0 : index
    %11 = vector.load %arg1[%c16, %c0_9] : memref<528x256xf32, #tpu.memory_space<vmem>>, vector<16x32xf32>
    %12 = vector.extract_strided_slice %4 {offsets = [0, 64], sizes = [32, 64], strides = [1, 1]} : vector<32x256xf32> to vector<32x64xf32>
    %cst_10 = arith.constant dense<0.000000e+00> : vector<16x64xf32>
    %13 = tpu.matmul %11, %12, %cst_10 {dimension_numbers = #tpu.dot_dimension_numbers<[1], [0], [0], [1], [0, 0, 1, 1], [], []>} : vector<16x32xf32>, vector<32x64xf32>, vector<16x64xf32> -> vector<16x64xf32>
    %14 = arith.addf %10, %13 : vector<16x64xf32>
    %c32 = arith.constant 32 : index
    %c0_11 = arith.constant 0 : index
    %15 = vector.load %arg1[%c32, %c0_11] : memref<528x256xf32, #tpu.memory_space<vmem>>, vector<16x32xf32>
    %16 = vector.extract_strided_slice %4 {offsets = [0, 128], sizes = [32, 64], strides = [1, 1]} : vector<32x256xf32> to vector<32x64xf32>
    %cst_12 = arith.constant dense<0.000000e+00> : vector<16x64xf32>
    %17 = tpu.matmul %15, %16, %cst_12 {dimension_numbers = #tpu.dot_dimension_numbers<[1], [0], [0], [1], [0, 0, 1, 1], [], []>} : vector<16x32xf32>, vector<32x64xf32>, vector<16x64xf32> -> vector<16x64xf32>
    %18 = arith.addf %14, %17 : vector<16x64xf32>
    %c48 = arith.constant 48 : index
    %c0_13 = arith.constant 0 : index
    %19 = vector.load %arg1[%c48, %c0_13] : memref<528x256xf32, #tpu.memory_space<vmem>>, vector<16x32xf32>
    %20 = vector.extract_strided_slice %4 {offsets = [0, 192], sizes = [32, 64], strides = [1, 1]} : vector<32x256xf32> to vector<32x64xf32>
    %cst_14 = arith.constant dense<0.000000e+00> : vector<16x64xf32>
    %21 = tpu.matmul %19, %20, %cst_14 {dimension_numbers = #tpu.dot_dimension_numbers<[1], [0], [0], [1], [0, 0, 1, 1], [], []>} : vector<16x32xf32>, vector<32x64xf32>, vector<16x64xf32> -> vector<16x64xf32>
    %22 = arith.addf %18, %21 : vector<16x64xf32>
    %cst_15 = arith.constant 0.000000e+00 : f32
    %23 = vector.broadcast %cst_15 : f32 to vector<16x64xf32>
    %24 = arith.cmpf oge, %22, %23 : vector<16x64xf32>
    %cst_16 = arith.constant 2.000000e-01 : f32
    %25 = vector.broadcast %cst_16 : f32 to vector<16x64xf32>
    %26 = arith.mulf %25, %22 : vector<16x64xf32>
    %27 = arith.select %24, %22, %26 : vector<16x64xi1>, vector<16x64xf32>
    %c168 = arith.constant 168 : index
    %c0_17 = arith.constant 0 : index
    %28 = vector.load %arg1[%c168, %c0_17] : memref<528x256xf32, #tpu.memory_space<vmem>>, vector<64x256xf32>
    %cst_18 = arith.constant dense<0.000000e+00> : vector<16x256xf32>
    %29 = tpu.matmul %27, %28, %cst_18 {dimension_numbers = #tpu.dot_dimension_numbers<[1], [0], [0], [1], [0, 0, 1, 1], [], []>} : vector<16x64xf32>, vector<64x256xf32>, vector<16x256xf32> -> vector<16x256xf32>
    %c232 = arith.constant 232 : index
    %c0_19 = arith.constant 0 : index
    %30 = vector.load %arg1[%c232, %c0_19] : memref<528x256xf32, #tpu.memory_space<vmem>>, vector<1x64xf32>
    %c136 = arith.constant 136 : index
    %c0_20 = arith.constant 0 : index
    %31 = vector.load %arg1[%c136, %c0_20] : memref<528x256xf32, #tpu.memory_space<vmem>>, vector<8x16xf32>
    %32 = vector.extract_strided_slice %29 {offsets = [0, 0], sizes = [16, 64], strides = [1, 1]} : vector<16x256xf32> to vector<16x64xf32>
    %cst_21 = arith.constant dense<0.000000e+00> : vector<8x64xf32>
    %33 = tpu.matmul %31, %32, %cst_21 {dimension_numbers = #tpu.dot_dimension_numbers<[1], [0], [0], [1], [0, 0, 1, 1], [], []>} : vector<8x16xf32>, vector<16x64xf32>, vector<8x64xf32> -> vector<8x64xf32>
    %34 = vector.broadcast %30 : vector<1x64xf32> to vector<8x64xf32>
    %35 = arith.addf %34, %33 : vector<8x64xf32>
    %c144 = arith.constant 144 : index
    %c0_22 = arith.constant 0 : index
    %36 = vector.load %arg1[%c144, %c0_22] : memref<528x256xf32, #tpu.memory_space<vmem>>, vector<8x16xf32>
    %37 = vector.extract_strided_slice %29 {offsets = [0, 64], sizes = [16, 64], strides = [1, 1]} : vector<16x256xf32> to vector<16x64xf32>
    %cst_23 = arith.constant dense<0.000000e+00> : vector<8x64xf32>
    %38 = tpu.matmul %36, %37, %cst_23 {dimension_numbers = #tpu.dot_dimension_numbers<[1], [0], [0], [1], [0, 0, 1, 1], [], []>} : vector<8x16xf32>, vector<16x64xf32>, vector<8x64xf32> -> vector<8x64xf32>
    %39 = arith.addf %35, %38 : vector<8x64xf32>
    %c152 = arith.constant 152 : index
    %c0_24 = arith.constant 0 : index
    %40 = vector.load %arg1[%c152, %c0_24] : memref<528x256xf32, #tpu.memory_space<vmem>>, vector<8x16xf32>
    %41 = vector.extract_strided_slice %29 {offsets = [0, 128], sizes = [16, 64], strides = [1, 1]} : vector<16x256xf32> to vector<16x64xf32>
    %cst_25 = arith.constant dense<0.000000e+00> : vector<8x64xf32>
    %42 = tpu.matmul %40, %41, %cst_25 {dimension_numbers = #tpu.dot_dimension_numbers<[1], [0], [0], [1], [0, 0, 1, 1], [], []>} : vector<8x16xf32>, vector<16x64xf32>, vector<8x64xf32> -> vector<8x64xf32>
    %43 = arith.addf %39, %42 : vector<8x64xf32>
    %c160 = arith.constant 160 : index
    %c0_26 = arith.constant 0 : index
    %44 = vector.load %arg1[%c160, %c0_26] : memref<528x256xf32, #tpu.memory_space<vmem>>, vector<8x16xf32>
    %45 = vector.extract_strided_slice %29 {offsets = [0, 192], sizes = [16, 64], strides = [1, 1]} : vector<16x256xf32> to vector<16x64xf32>
    %cst_27 = arith.constant dense<0.000000e+00> : vector<8x64xf32>
    %46 = tpu.matmul %44, %45, %cst_27 {dimension_numbers = #tpu.dot_dimension_numbers<[1], [0], [0], [1], [0, 0, 1, 1], [], []>} : vector<8x16xf32>, vector<16x64xf32>, vector<8x64xf32> -> vector<8x64xf32>
    %47 = arith.addf %43, %46 : vector<8x64xf32>
    %cst_28 = arith.constant 0.000000e+00 : f32
    %48 = vector.broadcast %cst_28 : f32 to vector<8x64xf32>
    %49 = arith.cmpf oge, %47, %48 : vector<8x64xf32>
    %cst_29 = arith.constant 2.000000e-01 : f32
    %50 = vector.broadcast %cst_29 : f32 to vector<8x64xf32>
    %51 = arith.mulf %50, %47 : vector<8x64xf32>
    %52 = arith.select %49, %47, %51 : vector<8x64xi1>, vector<8x64xf32>
    %c240 = arith.constant 240 : index
    %c0_30 = arith.constant 0 : index
    %53 = vector.load %arg1[%c240, %c0_30] : memref<528x256xf32, #tpu.memory_space<vmem>>, vector<64x4xf32>
    %cst_31 = arith.constant dense<0.000000e+00> : vector<8x4xf32>
    %54 = tpu.matmul %52, %53, %cst_31 {dimension_numbers = #tpu.dot_dimension_numbers<[1], [0], [0], [1], [0, 0, 1, 1], [], []>} : vector<8x64xf32>, vector<64x4xf32>, vector<8x4xf32> -> vector<8x4xf32>
    %c304 = arith.constant 304 : index
    %c0_32 = arith.constant 0 : index
    %55 = vector.load %arg1[%c304, %c0_32] : memref<528x256xf32, #tpu.memory_space<vmem>>, vector<1x4xf32>
    %56 = vector.broadcast %55 : vector<1x4xf32> to vector<8x4xf32>
    %57 = arith.addf %54, %56 : vector<8x4xf32>
    %c0_33 = arith.constant 0 : index
    %c0_34 = arith.constant 0 : index
    %58 = vector.load %arg2[%c0_33, %c0_34] : memref<8x128xf32, #tpu.memory_space<vmem>>, vector<8x4xf32>
    tpu.vector_store %arg2[%c0_33, %c0_34], %57 {strides = array<i32>} : memref<8x128xf32, #tpu.memory_space<vmem>>, vector<8x4xf32>,
    %c344 = arith.constant 344 : index
    %c0_35 = arith.constant 0 : index
    %59 = vector.load %arg1[%c344, %c0_35] : memref<528x256xf32, #tpu.memory_space<vmem>>, vector<64x128xf32>
    %cst_36 = arith.constant dense<0.000000e+00> : vector<32x128xf32>
    %60 = tpu.matmul %0, %59, %cst_36 {dimension_numbers = #tpu.dot_dimension_numbers<[1], [0], [0], [1], [0, 0, 1, 1], [], []>} : vector<32x64xf32>, vector<64x128xf32>, vector<32x128xf32> -> vector<32x128xf32>
    %c408 = arith.constant 408 : index
    %c0_37 = arith.constant 0 : index
    %61 = vector.load %arg1[%c408, %c0_37] : memref<528x256xf32, #tpu.memory_space<vmem>>, vector<1x32xf32>
    %c312 = arith.constant 312 : index
    %c0_38 = arith.constant 0 : index
    %62 = vector.load %arg1[%c312, %c0_38] : memref<528x256xf32, #tpu.memory_space<vmem>>, vector<8x32xf32>
    %63 = vector.extract_strided_slice %60 {offsets = [0, 0], sizes = [32, 32], strides = [1, 1]} : vector<32x128xf32> to vector<32x32xf32>
    %cst_39 = arith.constant dense<0.000000e+00> : vector<8x32xf32>
    %64 = tpu.matmul %62, %63, %cst_39 {dimension_numbers = #tpu.dot_dimension_numbers<[1], [0], [0], [1], [0, 0, 1, 1], [], []>} : vector<8x32xf32>, vector<32x32xf32>, vector<8x32xf32> -> vector<8x32xf32>
    %65 = vector.broadcast %61 : vector<1x32xf32> to vector<8x32xf32>
    %66 = arith.addf %65, %64 : vector<8x32xf32>
    %c320 = arith.constant 320 : index
    %c0_40 = arith.constant 0 : index
    %67 = vector.load %arg1[%c320, %c0_40] : memref<528x256xf32, #tpu.memory_space<vmem>>, vector<8x32xf32>
    %68 = vector.extract_strided_slice %60 {offsets = [0, 32], sizes = [32, 32], strides = [1, 1]} : vector<32x128xf32> to vector<32x32xf32>
    %cst_41 = arith.constant dense<0.000000e+00> : vector<8x32xf32>
    %69 = tpu.matmul %67, %68, %cst_41 {dimension_numbers = #tpu.dot_dimension_numbers<[1], [0], [0], [1], [0, 0, 1, 1], [], []>} : vector<8x32xf32>, vector<32x32xf32>, vector<8x32xf32> -> vector<8x32xf32>
    %70 = arith.addf %66, %69 : vector<8x32xf32>
    %c328 = arith.constant 328 : index
    %c0_42 = arith.constant 0 : index
    %71 = vector.load %arg1[%c328, %c0_42] : memref<528x256xf32, #tpu.memory_space<vmem>>, vector<8x32xf32>
    %72 = vector.extract_strided_slice %60 {offsets = [0, 64], sizes = [32, 32], strides = [1, 1]} : vector<32x128xf32> to vector<32x32xf32>
    %cst_43 = arith.constant dense<0.000000e+00> : vector<8x32xf32>
    %73 = tpu.matmul %71, %72, %cst_43 {dimension_numbers = #tpu.dot_dimension_numbers<[1], [0], [0], [1], [0, 0, 1, 1], [], []>} : vector<8x32xf32>, vector<32x32xf32>, vector<8x32xf32> -> vector<8x32xf32>
    %74 = arith.addf %70, %73 : vector<8x32xf32>
    %c336 = arith.constant 336 : index
    %c0_44 = arith.constant 0 : index
    %75 = vector.load %arg1[%c336, %c0_44] : memref<528x256xf32, #tpu.memory_space<vmem>>, vector<8x32xf32>
    %76 = vector.extract_strided_slice %60 {offsets = [0, 96], sizes = [32, 32], strides = [1, 1]} : vector<32x128xf32> to vector<32x32xf32>
    %cst_45 = arith.constant dense<0.000000e+00> : vector<8x32xf32>
    %77 = tpu.matmul %75, %76, %cst_45 {dimension_numbers = #tpu.dot_dimension_numbers<[1], [0], [0], [1], [0, 0, 1, 1], [], []>} : vector<8x32xf32>, vector<32x32xf32>, vector<8x32xf32> -> vector<8x32xf32>
    %78 = arith.addf %74, %77 : vector<8x32xf32>
    %cst_46 = arith.constant 0.000000e+00 : f32
    %79 = vector.broadcast %cst_46 : f32 to vector<8x32xf32>
    %80 = arith.cmpf oge, %78, %79 : vector<8x32xf32>
    %cst_47 = arith.constant 2.000000e-01 : f32
    %81 = vector.broadcast %cst_47 : f32 to vector<8x32xf32>
    %82 = arith.mulf %81, %78 : vector<8x32xf32>
    %83 = arith.select %80, %78, %82 : vector<8x32xi1>, vector<8x32xf32>
    %c448 = arith.constant 448 : index
    %c0_48 = arith.constant 0 : index
    %84 = vector.load %arg1[%c448, %c0_48] : memref<528x256xf32, #tpu.memory_space<vmem>>, vector<32x128xf32>
    %cst_49 = arith.constant dense<0.000000e+00> : vector<8x128xf32>
    %85 = tpu.matmul %83, %84, %cst_49 {dimension_numbers = #tpu.dot_dimension_numbers<[1], [0], [0], [1], [0, 0, 1, 1], [], []>} : vector<8x32xf32>, vector<32x128xf32>, vector<8x128xf32> -> vector<8x128xf32>
    %c480 = arith.constant 480 : index
    %c0_50 = arith.constant 0 : index
    %86 = vector.load %arg1[%c480, %c0_50] : memref<528x256xf32, #tpu.memory_space<vmem>>, vector<1x32xf32>
    %c416 = arith.constant 416 : index
    %c0_51 = arith.constant 0 : index
    %87 = vector.load %arg1[%c416, %c0_51] : memref<528x256xf32, #tpu.memory_space<vmem>>, vector<4x8xf32>
    %88 = vector.extract_strided_slice %85 {offsets = [0, 0], sizes = [8, 32], strides = [1, 1]} : vector<8x128xf32> to vector<8x32xf32>
    %cst_52 = arith.constant dense<0.000000e+00> : vector<4x32xf32>
    %89 = tpu.matmul %87, %88, %cst_52 {dimension_numbers = #tpu.dot_dimension_numbers<[1], [0], [0], [1], [0, 0, 1, 1], [], []>} : vector<4x8xf32>, vector<8x32xf32>, vector<4x32xf32> -> vector<4x32xf32>
    %90 = vector.broadcast %86 : vector<1x32xf32> to vector<4x32xf32>
    %91 = arith.addf %90, %89 : vector<4x32xf32>
    %c424 = arith.constant 424 : index
    %c0_53 = arith.constant 0 : index
    %92 = vector.load %arg1[%c424, %c0_53] : memref<528x256xf32, #tpu.memory_space<vmem>>, vector<4x8xf32>
    %93 = vector.extract_strided_slice %85 {offsets = [0, 32], sizes = [8, 32], strides = [1, 1]} : vector<8x128xf32> to vector<8x32xf32>
    %cst_54 = arith.constant dense<0.000000e+00> : vector<4x32xf32>
    %94 = tpu.matmul %92, %93, %cst_54 {dimension_numbers = #tpu.dot_dimension_numbers<[1], [0], [0], [1], [0, 0, 1, 1], [], []>} : vector<4x8xf32>, vector<8x32xf32>, vector<4x32xf32> -> vector<4x32xf32>
    %95 = arith.addf %91, %94 : vector<4x32xf32>
    %c432 = arith.constant 432 : index
    %c0_55 = arith.constant 0 : index
    %96 = vector.load %arg1[%c432, %c0_55] : memref<528x256xf32, #tpu.memory_space<vmem>>, vector<4x8xf32>
    %97 = vector.extract_strided_slice %85 {offsets = [0, 64], sizes = [8, 32], strides = [1, 1]} : vector<8x128xf32> to vector<8x32xf32>
    %cst_56 = arith.constant dense<0.000000e+00> : vector<4x32xf32>
    %98 = tpu.matmul %96, %97, %cst_56 {dimension_numbers = #tpu.dot_dimension_numbers<[1], [0], [0], [1], [0, 0, 1, 1], [], []>} : vector<4x8xf32>, vector<8x32xf32>, vector<4x32xf32> -> vector<4x32xf32>
    %99 = arith.addf %95, %98 : vector<4x32xf32>
    %c440 = arith.constant 440 : index
    %c0_57 = arith.constant 0 : index
    %100 = vector.load %arg1[%c440, %c0_57] : memref<528x256xf32, #tpu.memory_space<vmem>>, vector<4x8xf32>
    %101 = vector.extract_strided_slice %85 {offsets = [0, 96], sizes = [8, 32], strides = [1, 1]} : vector<8x128xf32> to vector<8x32xf32>
    %cst_58 = arith.constant dense<0.000000e+00> : vector<4x32xf32>
    %102 = tpu.matmul %100, %101, %cst_58 {dimension_numbers = #tpu.dot_dimension_numbers<[1], [0], [0], [1], [0, 0, 1, 1], [], []>} : vector<4x8xf32>, vector<8x32xf32>, vector<4x32xf32> -> vector<4x32xf32>
    %103 = arith.addf %99, %102 : vector<4x32xf32>
    %cst_59 = arith.constant 0.000000e+00 : f32
    %104 = vector.broadcast %cst_59 : f32 to vector<4x32xf32>
    %105 = arith.cmpf oge, %103, %104 : vector<4x32xf32>
    %cst_60 = arith.constant 2.000000e-01 : f32
    %106 = vector.broadcast %cst_60 : f32 to vector<4x32xf32>
    %107 = arith.mulf %106, %103 : vector<4x32xf32>
    %108 = arith.select %105, %103, %107 : vector<4x32xi1>, vector<4x32xf32>
    %c488 = arith.constant 488 : index
    %c0_61 = arith.constant 0 : index
    %109 = vector.load %arg1[%c488, %c0_61] : memref<528x256xf32, #tpu.memory_space<vmem>>, vector<32x2xf32>
    %cst_62 = arith.constant dense<0.000000e+00> : vector<4x2xf32>
    %110 = tpu.matmul %108, %109, %cst_62 {dimension_numbers = #tpu.dot_dimension_numbers<[1], [0], [0], [1], [0, 0, 1, 1], [], []>} : vector<4x32xf32>, vector<32x2xf32>, vector<4x2xf32> -> vector<4x2xf32>
    %c520 = arith.constant 520 : index
    %c0_63 = arith.constant 0 : index
    %111 = vector.load %arg1[%c520, %c0_63] : memref<528x256xf32, #tpu.memory_space<vmem>>, vector<1x2xf32>
    %112 = vector.broadcast %111 : vector<1x2xf32> to vector<4x2xf32>
    %113 = arith.addf %110, %112 : vector<4x2xf32>
    %c0_64 = arith.constant 0 : index
    %c4 = arith.constant 4 : index
    %114 = vector.load %arg2[%c0_64, %c4] : memref<8x128xf32, #tpu.memory_space<vmem>>, vector<4x2xf32>
    tpu.vector_store %arg2[%c0_64, %c4], %113 {strides = array<i32>} : memref<8x128xf32, #tpu.memory_space<vmem>>, vector<4x2xf32>,
    return
  }
}

</mosaic_0001>

<bundles_post_ra>
// kernel: forward.1
= control target key start
LH: loop header
LB: loop body
LE: loop exit
PB: predicated region body
PF: predicated region fallthrough
CT: control target
= control target key end

     0   :  { %7 = vsyncpa [#allocation3], 0  ;;  %s1009_s12 = smov [#allocation2]   ;;  %s1010_s14 = smov 256   ;;  %s1126_s0 = inlined_call_operand.vmem [shape: f32[32,64], index: 0, kind: input, shape index: {}]   ;;  %s1127_s1 = inlined_call_operand.hbm [shape: f32[528,256], index: 1, kind: input, shape index: {}]   ;;  %s1128_s2 = inlined_call_operand.vmem [shape: f32[8,128], index: 2, kind: output, shape index: {}]  }
   0x1   :  { %s14_s11 = sshll.u32 %s1127_s1, 4  ;;  %s16_s13 = sshll.u32 %s1009_s12, 4  ;;  %s15_s11 = int_to_ptr.hbm [resolvable:$true] %s14_s11  ;;  %s17_s13 = int_to_ptr.vmem [resolvable:$true] %s16_s13 }
   0x2   :  { %s1011_s15 = smov 16  }
   0x3   :  { %22 = dma.hbm_to_vmem [thread:$0]  %s15_s11, 16896, %s17_s13, [#allocation3], %s1010_s14, %s1010_s14, %s1011_s15  }
   0x4   :  { %1007 = dma.done.wait [#allocation3], 16896  }
   0x5   :  { %1008 = vsyncadd [#allocation3], 4294950400  ;;  %v46_v0 = vld [vmem:[#allocation2 + $0xf0] sm:$0xff]  ;;  %v47_v1 = vld [vmem:[#allocation2 + $0xf8] sm:$0xff]  ;;  %vm48_vm0 = vcmask 523264   ;;  %s1012_s23 = smov 64  }
   0x6   :  { %v44_v2 = vld [vmem:[#allocation2 + $0xe0] sm:$0xff]  ;;  %69 = vmatpush.msra.mxu0 %v46_v0  ;;  %98 = vmatpush.msra.mxu1 %v47_v1  ;;  %v45_v3 = vld [vmem:[#allocation2 + $0xe8] sm:$0xff]  ;;  %v42_v4 = vld [vmem:[#allocation2 + $0xd0] sm:$0xff]  ;;  %vm122_vm1 = vcmask 261120   ;;  %s1014_s24 = smov 32   ;;  %vm361_vm4 = vcmask 130048  }
   0x7   :  { %v43_v5 = vld [vmem:[#allocation2 + $0xd8] sm:$0xff]  ;;  %v40_v6 = vld [vmem:[#allocation2 + $0xc0] sm:$0xff]  ;;  %v41_v7 = vld [vmem:[#allocation2 + $0xc8] sm:$0xff]  ;;  %vm512_vm6 = vcmask 31744   ;;  %vm724_vm8 = vcmask 64512   ;;  %s1016_s29 = smov 4  }
   0x8   :  { %70 = vmatpush.msra.mxu0 %v44_v2  ;;  %99 = vmatpush.msra.mxu1 %v45_v3  ;;  %v38_v8 = vld [vmem:[#allocation2 + $0xb0] sm:$0xff]  ;;  %v39_v9 = vld [vmem:[#allocation2 + $0xb8] sm:$0xff]  ;;  %v36_v10 = vld [vmem:[#allocation2 + $0xa0] sm:$0xff]  ;;  %vm869_vm10 = vcmask 44064  }
   0x9   :  { %v37_v11 = vld [vmem:[#allocation2 + $0xa8] sm:$0xff]  ;;  %v34_v12 = vld [vmem:[#allocation2 + $0x90] sm:$0xff]  ;;  %v35_v13 = vld [vmem:[#allocation2 + $0x98] sm:$0xff] }
   0xa   :  { %71 = vmatpush.msra.mxu0 %v42_v4  ;;  %100 = vmatpush.msra.mxu1 %v43_v5  ;;  %v32_v14 = vld [vmem:[#allocation2 + $0x80] sm:$0xff]  ;;  %v33_v15 = vld [vmem:[#allocation2 + $0x88] sm:$0xff]  ;;  %v1056_v18 = vld [vmem:[%s1126_s0 + $0x10] sm:$0xff] }
   0xb   :  { %v1038_v16 = vld [vmem:[%s1126_s0] sm:$0xff]  ;;  %v1047_v17 = vld [vmem:[%s1126_s0 + $0x8] sm:$0xff]  ;;  %v1065_v19 = vld [vmem:[%s1126_s0 + $0x18] sm:$0xff]  ;;  %s1013_s0 = smov 96  }
   0xc   :  { %72 = vmatpush.msra.mxu0 %v40_v6  ;;  %101 = vmatpush.msra.mxu1 %v41_v7  ;;  %v120_v32 = vld [vmem:[#allocation2] sm:$0xff]  ;;  %v121_v33 = vld [vmem:[#allocation2 + $0x10] sm:$0xff]  ;;  %v306_v53 = vld [vmem:[#allocation2 + $0x1c8] sm:$0xff] }
   0xd   :  { %v203_v34 = vld [vmem:[#allocation2 + $0x40] sm:$0xff]  ;;  %v204_v35 = vld [vmem:[#allocation2 + $0x50] sm:$0xff]  ;;  %v304_v55 = vld [vmem:[#allocation2 + $0x1b8] sm:$0xff] }
   0xe   :  { %73 = vmatpush.msra.mxu0 %v38_v8  ;;  %102 = vmatpush.msra.mxu1 %v39_v9  ;;  %v154_v43 = vld [vmem:[#allocation2 + $0x20] sm:$0xff]  ;;  %v155_v49 = vld [vmem:[#allocation2 + $0x30] sm:$0xff]  ;;  %v302_v57 = vld [vmem:[#allocation2 + $0x1a8] sm:$0xff] }
   0xf   :  { %v236_v50 = vld [vmem:[#allocation2 + $0x60] sm:$0xff]  ;;  %v237_v51 = vld [vmem:[#allocation2 + $0x70] sm:$0xff]  ;;  %v300_v59 = vld [vmem:[#allocation2 + $0x198] sm:$0xff] }
  0x10   :  { %74 = vmatpush.msra.mxu0 %v36_v10  ;;  %103 = vmatpush.msra.mxu1 %v37_v11  ;;  %v305_v52 = vld [vmem:[#allocation2 + $0x1c0] sm:$0xff]  ;;  %v303_v54 = vld [vmem:[#allocation2 + $0x1b0] sm:$0xff]  ;;  %v298_v61 = vld [vmem:[#allocation2 + $0x188] sm:$0xff] }
  0x11   :  { %v301_v56 = vld [vmem:[#allocation2 + $0x1a0] sm:$0xff]  ;;  %v299_v58 = vld [vmem:[#allocation2 + $0x190] sm:$0xff]  ;;  %v296_v63 = vld [vmem:[#allocation2 + $0x178] sm:$0xff] }
  0x12   :  { %75 = vmatpush.msra.mxu0 %v34_v12  ;;  %104 = vmatpush.msra.mxu1 %v35_v13  ;;  %v297_v60 = vld [vmem:[#allocation2 + $0x180] sm:$0xff]  ;;  %v295_v62 = vld [vmem:[#allocation2 + $0x170] sm:$0xff]  ;;  %v294_v1 = vld [vmem:[#allocation2 + $0x168] sm:$0xff] }
  0x13   :  { %v293_v0 = vld [vmem:[#allocation2 + $0x160] sm:$0xff]  ;;  %v291_v2 = vld [vmem:[#allocation2 + $0x150] sm:$0xff]  ;;  %v292_v3 = vld [vmem:[#allocation2 + $0x158] sm:$0xff] }
  0x14   :  { %76 = vmatpush.msra.mxu0 %v32_v14  ;;  %105 = vmatpush.msra.mxu1 %v33_v15  ;;  %v521_v5 = vld [vmem:[#allocation2 + $0x320] sm:$0xff]  ;;  %v520_v6 = vld [vmem:[#allocation2 + $0x310] sm:$0xff] }
  0x15   :  { %876 = vmatmul.msk.f32.vlgmr.msra.gmra.mxu0 %vm48_vm0, %v1038_v16  ;;  %880 = vmatmul.msk.f32.vlgmr.msra.gmra.mxu1 %vm48_vm0, %v1038_v16  ;;  %v519_v9 = vld [vmem:[#allocation2 + $0x300] sm:$0xff]  ;;  %v518_v10 = vld [vmem:[#allocation2 + $0x2f0] sm:$0xff] }
  0x16   :  { %v119_v11 = vld [vmem:[#allocation2 + $0x100] ss:$0 sm:$0xff]  ;;  %v516_v13 = vld [vmem:[#allocation2 + $0x2d0] sm:$0xff] }
  0x17   :  { %v517_v12 = vld [vmem:[#allocation2 + $0x2e0] sm:$0xff] }
  0x1d   :  { %877 = vmatmul.msk.f32.gmra.mxu0 %vm48_vm0, %v1047_v17  ;;  %881 = vmatmul.msk.f32.gmra.mxu1 %vm48_vm0, %v1047_v17 }
  0x25   :  { %878 = vmatmul.msk.f32.gmra.mxu0 %vm48_vm0, %v1056_v18  ;;  %882 = vmatmul.msk.f32.gmra.mxu1 %vm48_vm0, %v1056_v18 }
  0x2d   :  { %879 = vmatmul.msk.f32.gmra.mxu0 %vm48_vm0, %v1065_v19  ;;  %883 = vmatmul.msk.f32.gmra.mxu1 %vm48_vm0, %v1065_v19 }
  0x92   :  { %v78_v20 = vpop.f32.mrf.mxu0  ;;  %v107_v21 = vpop.f32.mrf.mxu1 }
  0x9a   :  { %v81_v22 = vpop.f32.mrf.mxu0  ;;  %v110_v23 = vpop.f32.mrf.mxu1 }
  0x9b   :  { %v938_v30 = vpack.i.bf16 %v107_v21, %v110_v23  ;;  %v928_v31 = vpack.i.bf16 %v78_v20, %v81_v22 }
  0xa2   :  { %v84_v24 = vpop.f32.mrf.mxu0  ;;  %v113_v25 = vpop.f32.mrf.mxu1 }
  0xaa   :  { %v87_v26 = vpop.f32.mrf.mxu0  ;;  %v116_v27 = vpop.f32.mrf.mxu1 }
  0xab   :  { %141 = vmatpush.msra.mxu2 %v87_v26  ;;  %v933_v28 = vpack.i.bf16 %v113_v25, %v116_v27  ;;  %v923_v29 = vpack.i.bf16 %v84_v24, %v87_v26 }
  0xad   :  { %934 = vrot.lane.b32.xlu1 %v933_v28, %s1012_s23  ;;  %924 = vrot.lane.b32.xlu0 %v923_v29, %s1012_s23 }
  0xae   :  { %142 = vmatpush.msra.mxu2 %v84_v24 }
  0xb0   :  { %143 = vmatpush.msra.mxu2 %v81_v22  ;;  %v514_v22 = vld [vmem:[#allocation2 + $0x2b0] sm:$0xff] }
  0xb2   :  { %144 = vmatpush.msra.mxu2 %v78_v20  ;;  %v515_v20 = vld [vmem:[#allocation2 + $0x2c0] sm:$0xff] }
  0xb3   :  { %884 = vmatmul.msk.f32.vlgmr.msra.gmra.mxu2 %vm122_vm1, %v120_v32 }
  0xb4   :  { %223 = vmatpush.msrb.mxu2 %v116_v27 }
  0xb5   :  { %939 = vrot.lane.b32.xlu1 %v938_v30, %s1012_s23  ;;  %929 = vrot.lane.b32.xlu0 %v928_v31, %s1012_s23 }
  0xb6   :  { %224 = vmatpush.msrb.mxu2 %v113_v25 }
  0xb8   :  { %225 = vmatpush.msrb.mxu2 %v110_v23 }
  0xba   :  { %226 = vmatpush.msrb.mxu2 %v107_v21 }
  0xbb   :  { %885 = vmatmul.msk.f32.gmra.mxu2 %vm122_vm1, %v121_v33 }
  0xbc   :  { %321 = vmatpush.msra.mxu2 %v305_v52 }
  0xbe   :  { %322 = vmatpush.msra.mxu2 %v303_v54 }
  0xc0   :  { %323 = vmatpush.msra.mxu2 %v301_v56 }
  0xc2   :  { %324 = vmatpush.msra.mxu2 %v299_v58  ;;  %v484_v58 = vld [vmem:[#allocation2 + $0x220] sm:$0xff] }
  0xc3   :  { %888 = vmatmul.msk.f32.vlgmr.msrb.gmra.mxu2 %vm122_vm1, %v203_v34 }
  0xc4   :  { %325 = vmatpush.msra.mxu2 %v297_v60  ;;  %v482_v60 = vld [vmem:[#allocation2 + $0x200] sm:$0xff] }
  0xc6   :  { %326 = vmatpush.msra.mxu2 %v295_v62  ;;  %v480_v62 = vld [vmem:[#allocation2 + $0x1e0] sm:$0xff] }
  0xc8   :  { %327 = vmatpush.msra.mxu2 %v293_v0 }
  0xca   :  { %328 = vmatpush.msra.mxu2 %v291_v2 }
  0xcb   :  { %889 = vmatmul.msk.f32.gmra.mxu2 %vm122_vm1, %v204_v35 }
 0x11f   :  { %v925_v36 = vpop.permute.xlu0 %924  ;;  %v935_v39 = vpop.permute.xlu1 %934 }
 0x120   :  { %v926_v37 = vunpack.i.l.bf16 %v925_v36  ;;  %v927_v38 = vunpack.i.h.bf16 %v925_v36  ;;  %v936_v44 = vunpack.i.l.bf16 %v935_v39  ;;  %v937_v46 = vunpack.i.h.bf16 %v935_v39 }
 0x122   :  { %190 = vmatpush.msra.mxu3 %v926_v37 }
 0x124   :  { %191 = vmatpush.msra.mxu3 %v927_v38 }
 0x127   :  { %v930_v40 = vpop.permute.xlu0 %929  ;;  %v940_v45 = vpop.permute.xlu1 %939 }
 0x128   :  { %v931_v41 = vunpack.i.l.bf16 %v930_v40  ;;  %v932_v42 = vunpack.i.h.bf16 %v930_v40  ;;  %v941_v47 = vunpack.i.l.bf16 %v940_v45  ;;  %v942_v48 = vunpack.i.h.bf16 %v940_v45  ;;  %v360_v45 = vld [vmem:[#allocation2 + $0x110] sm:$0xff] }
 0x12a   :  { %192 = vmatpush.msra.mxu3 %v931_v41 }
 0x12c   :  { %193 = vmatpush.msra.mxu3 %v932_v42 }
 0x12d   :  { %886 = vmatmul.msk.f32.vlgmr.msra.gmra.mxu3 %vm122_vm1, %v154_v43 }
 0x12e   :  { %272 = vmatpush.msrb.mxu3 %v936_v44 }
 0x130   :  { %273 = vmatpush.msrb.mxu3 %v937_v46  ;;  %v419_v46 = vld [vmem:[#allocation2 + $0x130] sm:$0xff] }
 0x132   :  { %274 = vmatpush.msrb.mxu3 %v941_v47  ;;  %v487_v47 = vld [vmem:[#allocation2 + $0x250] sm:$0xff] }
 0x133   :  { %500 = vmatpush.msrb.mxu2 %v487_v47 }
 0x134   :  { %275 = vmatpush.msrb.mxu3 %v942_v48  ;;  %v486_v48 = vld [vmem:[#allocation2 + $0x240] sm:$0xff] }
 0x135   :  { %887 = vmatmul.msk.f32.gmra.mxu3 %vm122_vm1, %v155_v49  ;;  %v485_v49 = vld [vmem:[#allocation2 + $0x230] sm:$0xff]  ;;  %501 = vmatpush.msrb.mxu2 %v486_v48 }
 0x136   :  { %344 = vmatpush.msra.mxu3 %v306_v53  ;;  %v146_v4 = vpop.f32.mrf.mxu2  ;;  %v386_v53 = vld [vmem:[#allocation2 + $0x120] sm:$0xff] }
 0x137   :  { %v152_v14 = vadd.f32 %v146_v4, %v119_v11  ;;  %502 = vmatpush.msrb.mxu2 %v485_v49 }
 0x138   :  { %345 = vmatpush.msra.mxu3 %v304_v55 }
 0x139   :  { %503 = vmatpush.msrb.mxu2 %v484_v58 }
 0x13a   :  { %346 = vmatpush.msra.mxu3 %v302_v57  ;;  %v444_v57 = vld [vmem:[#allocation2 + $0x140] sm:$0xff] }
 0x13c   :  { %347 = vmatpush.msra.mxu3 %v300_v59  ;;  %v483_v59 = vld [vmem:[#allocation2 + $0x210] sm:$0xff] }
 0x13d   :  { %890 = vmatmul.msk.f32.vlgmr.msrb.gmra.mxu3 %vm122_vm1, %v236_v50  ;;  %504 = vmatpush.msrb.mxu2 %v483_v59  ;;  %v840_v59 = vld [vmem:[#allocation2 + $0x400] sm:$0xff] }
 0x13e   :  { %348 = vmatpush.msra.mxu3 %v298_v61  ;;  %v149_v7 = vpop.f32.mrf.mxu2  ;;  %v481_v61 = vld [vmem:[#allocation2 + $0x1f0] sm:$0xff] }
 0x13f   :  { %v153_v24 = vadd.f32 %v149_v7, %v119_v11  ;;  %505 = vmatpush.msrb.mxu2 %v482_v60  ;;  %v839_v60 = vld [vmem:[#allocation2 + $0x3f0] sm:$0xff] }
 0x140   :  { %349 = vmatpush.msra.mxu3 %v296_v63 }
 0x141   :  { %506 = vmatpush.msrb.mxu2 %v481_v61  ;;  %v838_v61 = vld [vmem:[#allocation2 + $0x3e0] sm:$0xff] }
 0x142   :  { %350 = vmatpush.msra.mxu3 %v294_v1 }
 0x143   :  { %507 = vmatpush.msrb.mxu2 %v480_v62  ;;  %v837_v62 = vld [vmem:[#allocation2 + $0x3d0] sm:$0xff] }
 0x144   :  { %351 = vmatpush.msra.mxu3 %v292_v3 }
 0x145   :  { %891 = vmatmul.msk.f32.gmra.mxu3 %vm122_vm1, %v237_v51 }
 0x146   :  { %530 = vmatpush.msrb.mxu3 %v521_v5  ;;  %v228_v21 = vpop.f32.mrf.mxu2 }
 0x148   :  { %531 = vmatpush.msrb.mxu3 %v520_v6 }
 0x14a   :  { %532 = vmatpush.msrb.mxu3 %v519_v9 }
 0x14c   :  { %533 = vmatpush.msrb.mxu3 %v518_v10 }
 0x14e   :  { %534 = vmatpush.msrb.mxu3 %v517_v12  ;;  %v231_v30 = vpop.f32.mrf.mxu2 }
 0x150   :  { %535 = vmatpush.msrb.mxu3 %v516_v13 }
 0x152   :  { %536 = vmatpush.msrb.mxu3 %v515_v20 }
 0x154   :  { %537 = vmatpush.msrb.mxu3 %v514_v22  ;;  %v577_v22 = vld [vmem:[#allocation2 + $0x280] sm:$0xff] }
 0x1b0   :  { %v195_v8 = vpop.f32.mrf.mxu3 }
 0x1b1   :  { %v201_v23 = vadd.f32 %v195_v8, %v152_v14 }
 0x1b3   :  { %v234_v25 = vadd.f32 %v228_v21, %v201_v23  ;;  %v552_v21 = vld [vmem:[#allocation2 + $0x270] sm:$0xff]  ;;  %v655_v23 = vld [vmem:[#allocation2 + $0x2a0] sm:$0xff] }
 0x1b8   :  { %v198_v15 = vpop.f32.mrf.mxu3 }
 0x1b9   :  { %v202_v28 = vadd.f32 %v198_v15, %v153_v24 }
 0x1bb   :  { %v235_v32 = vadd.f32 %v231_v30, %v202_v28 }
 0x1c0   :  { %v277_v26 = vpop.f32.mrf.mxu3 }
 0x1c1   :  { %v283_v27 = vadd.f32 %v277_v26, %v234_v25  ;;  %v359_v25 = vld [vmem:[#allocation2 + $0x1d0] ss:$0 sm:$0xff] }
 0x1c3   :  { %vm285_vm2 = vcmp.ge.f32.partialorder %v283_v27, 0.0  ;;  %v287_v29 = vmul.f32 0.2, %v283_v27 }
 0x1c5   :  { %v289_v31 = vsel %vm285_vm2, %v283_v27, %v287_v29 }
 0x1c6   :  { %892 = vmatmul.msk.f32.vlgmr.msra.gmra.mxu2 %vm48_vm0, %v289_v31  ;;  %894 = vmatmul.msk.f32.vlgmr.msra.gmra.mxu3 %vm48_vm0, %v289_v31 }
 0x1c8   :  { %v280_v33 = vpop.f32.mrf.mxu3 }
 0x1c9   :  { %v284_v34 = vadd.f32 %v280_v33, %v235_v32 }
 0x1cb   :  { %v288_v35 = vmul.f32 0.2, %v284_v34  ;;  %vm286_vm3 = vcmp.ge.f32.partialorder %v284_v34, 0.0 }
 0x1cd   :  { %v290_v36 = vsel %vm286_vm3, %v284_v34, %v288_v35  ;;  %v618_v35 = vld [vmem:[#allocation2 + $0x290] sm:$0xff] }
 0x1ce   :  { %893 = vmatmul.msk.f32.gmra.mxu2 %vm48_vm0, %v290_v36  ;;  %895 = vmatmul.msk.f32.gmra.mxu3 %vm48_vm0, %v290_v36  ;;  %v1015_v36 = vmov 0.0  }
 0x1cf   :  { %31 = vst [vmem:[%s1128_s2] sm:$0xff] %v1015_v36 }
 0x1d6   :  { %901 = vmatmul.msk.f32.vlgmr.msrb.gmra.mxu3 %vm48_vm0, %v1038_v16 }
 0x1de   :  { %902 = vmatmul.msk.f32.gmra.mxu3 %vm48_vm0, %v1047_v17 }
 0x1e6   :  { %903 = vmatmul.msk.f32.gmra.mxu3 %vm48_vm0, %v1056_v18 }
 0x1ee   :  { %904 = vmatmul.msk.f32.gmra.mxu3 %vm48_vm0, %v1065_v19 }
 0x249   :  { %v330_v37 = vpop.f32.mrf.mxu2  ;;  %v353_v38 = vpop.f32.mrf.mxu3 }
 0x251   :  { %v333_v39 = vpop.f32.mrf.mxu2  ;;  %v356_v40 = vpop.f32.mrf.mxu3 }
 0x252   :  { %379 = vmatpush.msrb.mxu0 %v333_v39  ;;  %v943_v41 = vpack.i.bf16 %v330_v37, %v333_v39  ;;  %v948_v42 = vpack.i.bf16 %v353_v38, %v356_v40  ;;  %v696_v39 = vld [vmem:[#allocation2 + $0x390] sm:$0xff] }
 0x254   :  { %944 = vrot.lane.b32.xlu2 %v943_v41, %s1012_s23  ;;  %380 = vmatpush.msrb.mxu0 %v330_v37  ;;  %v698_v37 = vld [vmem:[#allocation2 + $0x3b0] sm:$0xff]  ;;  %v488_v41 = vld [vmem:[#allocation2 + $0x260] ss:$0 sm:$0xff] }
 0x255   :  { %896 = vmatmul.msk.f32.vlgmr.msrb.gmra.mxu0 %vm361_vm4, %v360_v45 }
 0x256   :  { %437 = vmatpush.msra.mxu0 %v356_v40  ;;  %v695_v40 = vld [vmem:[#allocation2 + $0x380] sm:$0xff] }
 0x258   :  { %438 = vmatpush.msra.mxu0 %v353_v38  ;;  %v697_v38 = vld [vmem:[#allocation2 + $0x3a0] sm:$0xff] }
 0x259   :  { %v539_v16 = vpop.f32.mrf.mxu3 }
 0x25c   :  { %949 = vrot.lane.b32.xlu2 %v948_v42, %s1012_s23 }
 0x25d   :  { %898 = vmatmul.msk.f32.vlgmr.msra.gmra.mxu0 %vm361_vm4, %v419_v46 }
 0x261   :  { %v542_v17 = vpop.f32.mrf.mxu3 }
 0x262   :  { %v953_v19 = vpack.i.bf16 %v539_v16, %v542_v17 }
 0x264   :  { %954 = vrot.lane.b32.xlu2 %v953_v19, %s1012_s23 }
 0x269   :  { %v545_v18 = vpop.f32.mrf.mxu3 }
 0x26c   :  { %979 = vrot.lane.b32.xlu2 %v953_v19, %s1014_s24 }
 0x271   :  { %v548_v43 = vpop.f32.mrf.mxu3 }
 0x272   :  { %v968_v44 = vpack.i.bf16 %v545_v18, %v548_v43  ;;  %568 = vmatpush.msrb.mxu0 %v548_v43 }
 0x274   :  { %969 = vrot.lane.b32.xlu1 %v968_v44, %s1013_s0  ;;  %959 = vrot.lane.b32.xlu0 %v968_v44, %s1012_s23 }
 0x275   :  { %569 = vmatpush.msrb.mxu0 %v545_v18 }
 0x277   :  { %570 = vmatpush.msrb.mxu0 %v542_v17  ;;  %v551_v17 = vld [vmem:[#allocation2 + $0x330] ss:$0 sm:$0xff] }
 0x279   :  { %571 = vmatpush.msrb.mxu0 %v539_v16 }
 0x27a   :  { %905 = vmatmul.msk.f32.vlgmr.msrb.gmra.mxu0 %vm122_vm1, %v552_v21 }
 0x27c   :  { %974 = vrot.lane.b32.xlu1 %v968_v44, %s1014_s24  ;;  %964 = vrot.lane.b32.xlu0 %v953_v19, %s1013_s0 }
 0x2ae   :  { %v945_v50 = vpop.permute.xlu2 %944 }
 0x2af   :  { %v946_v51 = vunpack.i.l.bf16 %v945_v50  ;;  %v947_v52 = vunpack.i.h.bf16 %v945_v50 }
 0x2b1   :  { %412 = vmatpush.msrb.mxu1 %v946_v51 }
 0x2b3   :  { %413 = vmatpush.msrb.mxu1 %v947_v52  ;;  %v723_v52 = vld [vmem:[#allocation2 + $0x340] sm:$0xf] }
 0x2b4   :  { %897 = vmatmul.msk.f32.vlgmr.msrb.gmra.mxu1 %vm361_vm4, %v386_v53  ;;  %v778_v53 = vld [vmem:[#allocation2 + $0x360] sm:$0xf] }
 0x2b6   :  { %v950_v54 = vpop.permute.xlu2 %949 }
 0x2b7   :  { %v951_v55 = vunpack.i.l.bf16 %v950_v54  ;;  %v952_v56 = vunpack.i.h.bf16 %v950_v54 }
 0x2b9   :  { %470 = vmatpush.msra.mxu1 %v951_v55  ;;  %v749_v55 = vld [vmem:[#allocation2 + $0x350] sm:$0xf] }
 0x2bb   :  { %471 = vmatpush.msra.mxu1 %v952_v56 }
 0x2bc   :  { %899 = vmatmul.msk.f32.vlgmr.msra.gmra.mxu1 %vm361_vm4, %v444_v57  ;;  %v806_v57 = vld [vmem:[#allocation2 + $0x370] sm:$0xf] }
 0x2be   :  { %v955_v63 = vpop.permute.xlu2 %954 }
 0x2bf   :  { %v956_v6 = vunpack.i.l.bf16 %v955_v63  ;;  %v957_v7 = vunpack.i.h.bf16 %v955_v63  ;;  %v722_v63 = vld [vmem:[#allocation2 + $0x3c0] ss:$0 sm:$0xff] }
 0x2c6   :  { %v980_v9 = vpop.permute.xlu2 %979 }
 0x2c7   :  { %v981_v12 = vunpack.i.l.bf16 %v980_v9  ;;  %v982_v13 = vunpack.i.h.bf16 %v980_v9 }
 0x2d2   :  { %v382_v24 = vpop.f32.mrf.mxu0 }
 0x2d3   :  { %v385_v26 = vadd.f32 %v382_v24, %v359_v25 }
 0x2da   :  { %v440_v29 = vpop.f32.mrf.mxu0 }
 0x2e6   :  { %v970_v0 = vpop.permute.xlu1 %969  ;;  %v960_v1 = vpop.permute.xlu0 %959 }
 0x2e7   :  { %v972_v2 = vunpack.i.h.bf16 %v970_v0  ;;  %v971_v3 = vunpack.i.l.bf16 %v970_v0  ;;  %v962_v4 = vunpack.i.h.bf16 %v960_v1  ;;  %v961_v5 = vunpack.i.l.bf16 %v960_v1 }
 0x2e9   :  { %646 = vmatpush.msra.mxu2 %v961_v5  ;;  %609 = vmatpush.msrb.mxu1 %v971_v3 }
 0x2eb   :  { %647 = vmatpush.msra.mxu2 %v962_v4  ;;  %610 = vmatpush.msrb.mxu1 %v972_v2 }
 0x2ed   :  { %648 = vmatpush.msra.mxu2 %v956_v6 }
 0x2ee   :  { %v975_v8 = vpop.permute.xlu1 %974  ;;  %v965_v14 = vpop.permute.xlu0 %964 }
 0x2ef   :  { %v977_v10 = vunpack.i.h.bf16 %v975_v8  ;;  %v976_v11 = vunpack.i.l.bf16 %v975_v8  ;;  %649 = vmatpush.msra.mxu2 %v957_v7  ;;  %v967_v15 = vunpack.i.h.bf16 %v965_v14  ;;  %v966_v20 = vunpack.i.l.bf16 %v965_v14 }
 0x2f1   :  { %683 = vmatpush.msra.mxu0 %v976_v11  ;;  %611 = vmatpush.msrb.mxu1 %v966_v20 }
 0x2f3   :  { %684 = vmatpush.msra.mxu0 %v977_v10  ;;  %612 = vmatpush.msrb.mxu1 %v967_v15  ;;  %v841_v10 = vld [vmem:[#allocation2 + $0x410] ss:$0 sm:$0xff] }
 0x2f4   :  { %906 = vmatmul.msk.f32.vlgmr.msrb.gmra.mxu1 %vm122_vm1, %v577_v22 }
 0x2f5   :  { %685 = vmatpush.msra.mxu0 %v981_v12  ;;  %714 = vmatpush.msra.mxu1 %v698_v37 }
 0x2f7   :  { %686 = vmatpush.msra.mxu0 %v982_v13  ;;  %715 = vmatpush.msra.mxu1 %v697_v38  ;;  %v573_v16 = vpop.f32.mrf.mxu0 }
 0x2f8   :  { %908 = vmatmul.msk.f32.vlgmr.msra.gmra.mxu0 %vm122_vm1, %v655_v23  ;;  %v576_v43 = vadd.f32 %v573_v16, %v551_v17 }
 0x2f9   :  { %716 = vmatpush.msra.mxu1 %v696_v39 }
 0x2fb   :  { %717 = vmatpush.msra.mxu1 %v695_v40 }
 0x331   :  { %v415_v27 = vpop.f32.mrf.mxu1 }
 0x332   :  { %v418_v28 = vadd.f32 %v415_v27, %v385_v26 }
 0x334   :  { %v443_v30 = vadd.f32 %v440_v29, %v418_v28 }
 0x339   :  { %v473_v31 = vpop.f32.mrf.mxu1 }
 0x33a   :  { %v476_v32 = vadd.f32 %v473_v31, %v443_v30 }
 0x33c   :  { %vm477_vm5 = vcmp.ge.f32.partialorder %v476_v32, 0.0  ;;  %v478_v33 = vmul.f32 0.2, %v476_v32 }
 0x33e   :  { %v479_v34 = vsel %vm477_vm5, %v476_v32, %v478_v33 }
 0x33f   :  { %900 = vmatmul.msk.f32.vlgmr.msrb.gmra.mxu2 %vm48_vm0, %v479_v34 }
 0x347   :  { %907 = vmatmul.msk.f32.vlgmr.msra.gmra.mxu2 %vm122_vm1, %v618_v35 }
 0x371   :  { %v614_v44 = vpop.f32.mrf.mxu1 }
 0x372   :  { %v617_v19 = vadd.f32 %v614_v44, %v576_v43 }
 0x375   :  { %v688_v46 = vpop.f32.mrf.mxu0 }
 0x3c2   :  { %v509_v42 = vpop.f32.mrf.mxu2 }
 0x3c3   :  { %v510_v18 = vadd.f32 %v509_v42, %v488_v41 }
 0x3c5   :  { %513 = vst.msk [vmem:[%s1128_s2] sm:$0xff] %vm512_vm6, %v510_v18 }
 0x3ca   :  { %v651_v45 = vpop.f32.mrf.mxu2 }
 0x3cb   :  { %v654_v47 = vadd.f32 %v651_v45, %v617_v19 }
 0x3cd   :  { %v691_v48 = vadd.f32 %v688_v46, %v654_v47 }
 0x3cf   :  { %vm692_vm7 = vcmp.ge.f32.partialorder %v691_v48, 0.0  ;;  %v693_v49 = vmul.f32 0.2, %v691_v48 }
 0x3d1   :  { %v694_v50 = vsel %vm692_vm7, %v691_v48, %v693_v49 }
 0x3d2   :  { %909 = vmatmul.msk.f32.vlgmr.msra.gmra.mxu1 %vm122_vm1, %v694_v50 }
 0x44f   :  { %v719_v51 = vpop.f32.mrf.mxu1 }
 0x450   :  { %779 = vrot.lane.b32.xlu2 %v719_v51, %s1012_s23  ;;  %751 = vrot.lane.b32.xlu1 %v719_v51, %s1013_s0 }
 0x451   :  { %807 = vrot.lane.b32.xlu0 %v719_v51, %s1014_s24  ;;  %743 = vmatpush.msrb.mxu2 %v719_v51 }
 0x452   :  { %910 = vmatmul.msk.f32.vlgmr.msrb.gmra.mxu2 %vm724_vm8, %v723_v52 }
 0x4aa   :  { %v780_v54 = vpop.permute.xlu2 %779 }
 0x4ab   :  { %800 = vmatpush.msrb.mxu1 %v780_v54 }
 0x4ac   :  { %912 = vmatmul.msk.f32.vlgmr.msrb.gmra.mxu1 %vm724_vm8, %v778_v53 }
 0x4c2   :  { %v752_v56 = vpop.permute.xlu1 %751 }
 0x4c3   :  { %v808_v58 = vpop.permute.xlu0 %807  ;;  %772 = vmatpush.msrb.mxu0 %v752_v56 }
 0x4c4   :  { %828 = vmatpush.msra.mxu2 %v808_v58  ;;  %911 = vmatmul.msk.f32.vlgmr.msrb.gmra.mxu0 %vm724_vm8, %v749_v55 }
 0x4c5   :  { %913 = vmatmul.msk.f32.vlgmr.msra.gmra.mxu2 %vm724_vm8, %v806_v57  ;;  %857 = vmatpush.msra.mxu0 %v840_v59 }
 0x4c7   :  { %858 = vmatpush.msra.mxu0 %v839_v60 }
 0x4c9   :  { %859 = vmatpush.msra.mxu0 %v838_v61 }
 0x4cb   :  { %860 = vmatpush.msra.mxu0 %v837_v62 }
 0x4d5   :  { %v745_v0 = vpop.f32.mrf.mxu2 }
 0x4d6   :  { %v748_v1 = vadd.f32 %v745_v0, %v722_v63 }
 0x529   :  { %v802_v4 = vpop.f32.mrf.mxu1 }
 0x541   :  { %v774_v2 = vpop.f32.mrf.mxu0 }
 0x542   :  { %v777_v3 = vadd.f32 %v774_v2, %v748_v1 }
 0x544   :  { %v805_v5 = vadd.f32 %v802_v4, %v777_v3 }
 0x548   :  { %v830_v6 = vpop.f32.mrf.mxu2 }
 0x549   :  { %v833_v7 = vadd.f32 %v830_v6, %v805_v5 }
 0x54b   :  { %vm834_vm9 = vcmp.ge.f32.partialorder %v833_v7, 0.0  ;;  %v835_v8 = vmul.f32 0.2, %v833_v7 }
 0x54d   :  { %v836_v9 = vsel %vm834_vm9, %v833_v7, %v835_v8 }
 0x54e   :  { %914 = vmatmul.msk.f32.vlgmr.msra.gmra.mxu0 %vm122_vm1, %v836_v9 }
 0x5cb   :  { %v862_v11 = vpop.f32.mrf.mxu0 }
 0x5cc   :  { %v863_v12 = vadd.f32 %v862_v11, %v841_v10 }
 0x5ce   :  { %866 = vrot.lane.b32.xlu0 %v863_v12, %s1016_s29 }
 0x640   :  { %v867_v13 = vpop.permute.xlu0 %866 }
 0x641   :  { %870 = vst.msk [vmem:[%s1128_s2] sm:$0xf] %vm869_vm10, %v867_v13 }
 0x642   :  { %875 = vsyncpa [#allocation3], 1 }

</bundles_post_ra>
